<compile_context>
chip_gen: v6e
topology: v6e:2x2x1
jax: 0.10.0
libtpu: 0.0.40
codegen_flags: <defaults>
</compile_context>

<pallas_src>
from functools import lru_cache

import numpy as np
import jax
import jax.numpy as jnp
from jax import lax
from jax.experimental import pallas as pl
from jax.experimental.pallas import tpu as pltpu


def _gaussian_kernel_3x3(sigma=1.0):
    x = np.arange(-1, 2, dtype=np.float32)
    g = np.exp(-x ** 2 / (2.0 * sigma ** 2))
    k = np.outer(g, g)
    return (k / k.sum()).astype(np.float32)


# TODO(synk): `Laplace(dim)` is not defined in the provided source; assume the
# standard depthwise 3x3 Laplacian [[0,1,0],[1,-4,1],[0,1,0]], padding=1, no bias.
_LAPLACE_K = np.array([[0.0, 1.0, 0.0],
                       [1.0, -4.0, 1.0],
                       [0.0, 1.0, 0.0]], dtype=np.float32)
_GAUSS_K = _gaussian_kernel_3x3(1.0)


def _conv_gap_weights(k3, h, w):
    """Per-pixel weights s.t. sum_hw(depthwise_conv3x3_zeropad(x))[c] =
    sum_{r,q} wmap[r,q] * x[c,r,q].  Returned flattened as (1, h*w) f32."""
    rowmask = np.zeros((3, h), np.float32)
    rowmask[0, :h - 1] = 1.0   # dy = 0 -> pixel rows 0 .. h-2
    rowmask[1, :] = 1.0        # dy = 1 -> all rows
    rowmask[2, 1:] = 1.0       # dy = 2 -> rows 1 .. h-1
    colmask = np.zeros((3, w), np.float32)
    colmask[0, :w - 1] = 1.0
    colmask[1, :] = 1.0
    colmask[2, 1:] = 1.0
    wmap = np.einsum("yx,yr,xq->rq", k3, rowmask, colmask)
    return wmap.reshape(1, h * w).astype(np.float32)


@lru_cache(maxsize=None)
def _gap_weight_constants(h, w, hwp):
    """(wg, wl) with 1/HW folded in and zero-padded to hwp lanes."""
    hw = h * w
    inv_hw = 1.0 / float(hw)
    wg = _conv_gap_weights(_GAUSS_K, h, w) * inv_hw
    wl = _conv_gap_weights(_LAPLACE_K, h, w) * inv_hw
    if hwp > hw:
        pad = ((0, 0), (0, hwp - hw))
        wg = np.pad(wg, pad)
        wl = np.pad(wl, pad)
    return wg.astype(np.float32), wl.astype(np.float32)


def _vmem_budget_bytes():
    """~75% of this generation's physical VMEM (48 MiB on v7x, 96 MiB v5e/v6e)."""
    try:
        cap = int(pltpu.get_tpu_info().vmem_capacity_bytes)
    except Exception:
        cap = 64 << 20
    return (cap * 3) // 4


def acs_kernel(x_ref, wg_ref, wl_ref, w1a_ref, w1b_ref, w2t_ref, o_ref):
    # x_ref  : (TB, C, HWP) image block, channels on sublanes, pixels on lanes
    # wg/wl  : (1, HWP) per-pixel conv+GAP weights (1/HW folded, pad lanes zero)
    # w1a/w1b: (C, HID) fc1 weight halves (gaussian / laplacian inputs), (in, out)
    # w2t    : (C, HID) fc2 weight, (out, in)
    # o_ref  : (TB, C, HWP)
    x = x_ref[...].astype(jnp.float32)                         # (TB, C, HWP)

    # GAP(gaussian_conv(x)) and GAP(Laplace(x)) per (batch, channel) -> (TB, C, 1)
    gl = jnp.sum(x * wg_ref[...], axis=-1, keepdims=True)
    gh = jnp.sum(x * wl_ref[...], axis=-1, keepdims=True)

    # fc1 (bias=False) + ReLU, kept on VPU/XLU (rank-1 gemv; MXU not worth it):
    #   hid[b, j] = relu(sum_c gl[b,c]*w1a[c,j] + gh[b,c]*w1b[c,j])
    hid = jnp.sum(w1a_ref[...][None] * gl + w1b_ref[...][None] * gh,
                  axis=1, keepdims=True)                       # (TB, 1, HID)
    hid = jnp.maximum(hid, 0.0)

    # fc2 (bias=False): logits[b, k] = sum_j hid[b, j] * w2t[k, j]
    logits = jnp.sum(w2t_ref[...][None] * hid, axis=-1, keepdims=True)  # (TB, C, 1)

    # softmax over channels (sublane axis), exact reciprocal
    m = jnp.max(logits, axis=1, keepdims=True)
    e = jnp.exp(logits - m)
    c_w = e / jnp.sum(e, axis=1, keepdims=True)                # (TB, C, 1)

    # x * c_w + x   (lane-dense unmasked store)
    o_ref[...] = (x * (1.0 + c_w)).astype(o_ref.dtype)


@jax.jit
def adaptive_channel_selection(x_nchw, w1, w2):
    """x_nchw: (B, C, H, W); w1: (2C, HID) (in,out); w2: (HID, C) (in,out)."""
    b, c, h, w = x_nchw.shape
    hid = w1.shape[1]
    hw = h * w
    hwp = ((hw + 127) // 128) * 128          # lane-dense (multiple of 128)

    # Preserve f32 / bf16 I/O dtype; anything else is computed and stored in f32.
    io_dtype = x_nchw.dtype
    if io_dtype not in (jnp.dtype(jnp.float32), jnp.dtype(jnp.bfloat16)):
        io_dtype = jnp.dtype(jnp.float32)
    itemsize = io_dtype.itemsize

    x_flat = x_nchw.reshape(b, c, hw).astype(io_dtype)  # free for contiguous NCHW
    if hwp > hw:
        x_flat = jnp.pad(x_flat, ((0, 0), (0, 0), (0, hwp - hw)))

    wg_np, wl_np = _gap_weight_constants(h, w, hwp)      # lru-cached host constants
    wg = jnp.asarray(wg_np)
    wl = jnp.asarray(wl_np)
    w1f = w1.astype(jnp.float32)
    w1a = w1f[:c, :]           # pairs with GAP(gaussian_conv(x)) (first half of concat)
    w1b = w1f[c:, :]           # pairs with GAP(Laplace(x))       (second half)
    w2t = w2.astype(jnp.float32).T                        # (C, HID)

    # --- generation-aware batch tiling -------------------------------------
    budget = _vmem_budget_bytes()
    per_b_bytes = c * hwp * itemsize                      # one batch image block
    weight_bytes = 2 * (2 * hwp * 4 + 3 * c * hid * 4)    # double-buffered consts
    scratch_margin = 4 << 20
    usable = max(budget - weight_bytes - scratch_margin, 4 * per_b_bytes)
    tb_vmem = max(1, usable // (4 * per_b_bytes))         # 2x in + 2x out buffers
    tb_target = max(1, (4 << 20) // per_b_bytes)          # ~4 MiB per DMA block
    tb = int(min(b, tb_vmem, tb_target))
    # If blocks are already large, keep >=2 grid steps (keeps both v7x TCs busy).
    if b >= 2 and tb == b and per_b_bytes * (b // 2) >= (1 << 20):
        tb = b // 2
    while b % tb:                                          # full blocks only
        tb -= 1
    tb = max(tb, 1)

    blk_bytes = tb * c * hwp * itemsize
    needed = 4 * blk_bytes + weight_bytes + scratch_margin
    vmem_limit = int(min(budget, max(needed, 16 << 20)))

    out_flat = pl.pallas_call(
        acs_kernel,
        out_shape=jax.ShapeDtypeStruct((b, c, hwp), io_dtype),
        grid_spec=pltpu.PrefetchScalarGridSpec(
            num_scalar_prefetch=0,
            grid=(b // tb,),
            in_specs=[
                pl.BlockSpec((tb, c, hwp), lambda i: (i, 0, 0)),
                pl.BlockSpec((1, hwp), lambda i: (0, 0)),
                pl.BlockSpec((1, hwp), lambda i: (0, 0)),
                pl.BlockSpec((c, hid), lambda i: (0, 0)),
                pl.BlockSpec((c, hid), lambda i: (0, 0)),
                pl.BlockSpec((c, hid), lambda i: (0, 0)),
            ],
            out_specs=pl.BlockSpec((tb, c, hwp), lambda i: (i, 0, 0)),
        ),
        compiler_params=pltpu.CompilerParams(
            dimension_semantics=("parallel",),
            vmem_limit_bytes=vmem_limit),
    )(x_flat, wg, wl, w1a, w1b, w2t)

    out_flat = out_flat[:, :, :hw]
    return out_flat.reshape(b, c, h, w).astype(x_nchw.dtype)


def reference(x_nchw, w1, w2):
    """Pure-JAX reference mirroring the PyTorch forward (for verification)."""
    b, c, h, w = x_nchw.shape
    gk = jnp.tile(jnp.asarray(_GAUSS_K).reshape(1, 1, 3, 3), (c, 1, 1, 1))
    lk = jnp.tile(jnp.asarray(_LAPLACE_K).reshape(1, 1, 3, 3), (c, 1, 1, 1))
    dn = lax.conv_dimension_numbers(x_nchw.shape, gk.shape,
                                    ("NCHW", "OIHW", "NCHW"))
    x_l = lax.conv_general_dilated(x_nchw, gk, (1, 1), "SAME",
                                   dimension_numbers=dn, feature_group_count=c)
    x_h = lax.conv_general_dilated(x_nchw, lk, (1, 1), "SAME",
                                   dimension_numbers=dn, feature_group_count=c)
    c_x = jnp.concatenate([x_l, x_h], axis=1)           # (b, 2c, h, w)
    c_vec = jnp.mean(c_x, axis=(2, 3))                  # (b, 2c)  == GAP
    hid = jnp.maximum(c_vec @ w1, 0.0)
    c_w = jax.nn.softmax(hid @ w2, axis=-1)             # (b, c)
    return x_nchw * c_w[:, :, None, None] + x_nchw


if __name__ == "__main__":
    # Small shapes consistent with the module: dim (channels) = 8, ratio = 4.
    B, C, H, W = 2, 8, 16, 16
    RATIO = 4
    HID = (2 * C) // RATIO

    key = jax.random.PRNGKey(0)
    kx, k1, k2 = jax.random.split(key, 3)
    x = jax.random.normal(kx, (B, C, H, W), dtype=jnp.float32)
    # fc weights, stored transposed relative to torch.nn.Linear (in, out):
    w1 = jax.random.normal(k1, (2 * C, HID), dtype=jnp.float32) * 0.1
    w2 = jax.random.normal(k2, (HID, C), dtype=jnp.float32) * 0.1

    out = adaptive_channel_selection(x, w1, w2)
    out = jax.block_until_ready(out)

    ref = reference(x, w1, w2)
    np.testing.assert_allclose(np.asarray(out), np.asarray(ref),
                               rtol=1e-3, atol=1e-3)
    print("KERNEL_OK")
</pallas_src>

<mosaic_0001>
module attributes {stable_mosaic.version = 11 : i64} {
  func.func @acs_kernel(%arg0: i32, %arg1: memref<2x8x256xf32, #tpu.memory_space<vmem>>, %arg2: memref<1x256xf32, #tpu.memory_space<vmem>>, %arg3: memref<1x256xf32, #tpu.memory_space<vmem>>, %arg4: memref<8x4xf32, #tpu.memory_space<vmem>>, %arg5: memref<8x4xf32, #tpu.memory_space<vmem>>, %arg6: memref<8x4xf32, #tpu.memory_space<vmem>>, %arg7: memref<2x8x256xf32, #tpu.memory_space<vmem>>) attributes {dimension_semantics = [#tpu.dimension_semantics<parallel>], iteration_bounds = array<i64: 1>, scalar_prefetch = 0 : i64, scratch_operands = 0 : i64, tpu.core_type = #tpu.core_type<tc>, window_params = [{transform_indices = @transform_0, window_bounds = array<i64: 2, 8, 256>}, {pipeline_mode = #tpu.pipeline_mode<synchronous>, transform_indices = @transform_1, window_bounds = array<i64: 1, 256>}, {pipeline_mode = #tpu.pipeline_mode<synchronous>, transform_indices = @transform_2, window_bounds = array<i64: 1, 256>}, {pipeline_mode = #tpu.pipeline_mode<synchronous>, transform_indices = @transform_3, window_bounds = array<i64: 8, 4>}, {pipeline_mode = #tpu.pipeline_mode<synchronous>, transform_indices = @transform_4, window_bounds = array<i64: 8, 4>}, {pipeline_mode = #tpu.pipeline_mode<synchronous>, transform_indices = @transform_5, window_bounds = array<i64: 8, 4>}, {transform_indices = @transform_6, window_bounds = array<i64: 2, 8, 256>}]} {
    %c0 = arith.constant 0 : index
    %c0_0 = arith.constant 0 : index
    %c0_1 = arith.constant 0 : index
    %0 = vector.load %arg1[%c0, %c0_0, %c0_1] : memref<2x8x256xf32, #tpu.memory_space<vmem>>, vector<2x8x256xf32>
    %c0_2 = arith.constant 0 : index
    %c0_3 = arith.constant 0 : index
    %1 = vector.load %arg2[%c0_2, %c0_3] : memref<1x256xf32, #tpu.memory_space<vmem>>, vector<1x256xf32>
    %2 = vector.shape_cast %1 : vector<1x256xf32> to vector<1x1x256xf32>
    %3 = vector.broadcast %2 : vector<1x1x256xf32> to vector<2x8x256xf32>
    %4 = arith.mulf %0, %3 : vector<2x8x256xf32>
    %cst = arith.constant dense<0.000000e+00> : vector<2x8xf32>
    %5 = vector.multi_reduction <add>, %4, %cst [2] : vector<2x8x256xf32> to vector<2x8xf32>
    %6 = vector.shape_cast %5 : vector<2x8xf32> to vector<2x8x1xf32>
    %c0_4 = arith.constant 0 : index
    %c0_5 = arith.constant 0 : index
    %7 = vector.load %arg3[%c0_4, %c0_5] : memref<1x256xf32, #tpu.memory_space<vmem>>, vector<1x256xf32>
    %8 = vector.shape_cast %7 : vector<1x256xf32> to vector<1x1x256xf32>
    %9 = vector.broadcast %8 : vector<1x1x256xf32> to vector<2x8x256xf32>
    %10 = arith.mulf %0, %9 : vector<2x8x256xf32>
    %cst_6 = arith.constant dense<0.000000e+00> : vector<2x8xf32>
    %11 = vector.multi_reduction <add>, %10, %cst_6 [2] : vector<2x8x256xf32> to vector<2x8xf32>
    %12 = vector.shape_cast %11 : vector<2x8xf32> to vector<2x8x1xf32>
    %c0_7 = arith.constant 0 : index
    %c0_8 = arith.constant 0 : index
    %13 = vector.load %arg4[%c0_7, %c0_8] : memref<8x4xf32, #tpu.memory_space<vmem>>, vector<8x4xf32>
    %14 = vector.shape_cast %13 : vector<8x4xf32> to vector<1x8x4xf32>
    %15 = vector.broadcast %14 : vector<1x8x4xf32> to vector<2x8x4xf32>
    %16 = vector.broadcast %6 : vector<2x8x1xf32> to vector<2x8x4xf32>
    %17 = arith.mulf %15, %16 : vector<2x8x4xf32>
    %c0_9 = arith.constant 0 : index
    %c0_10 = arith.constant 0 : index
    %18 = vector.load %arg5[%c0_9, %c0_10] : memref<8x4xf32, #tpu.memory_space<vmem>>, vector<8x4xf32>
    %19 = vector.shape_cast %18 : vector<8x4xf32> to vector<1x8x4xf32>
    %20 = vector.broadcast %19 : vector<1x8x4xf32> to vector<2x8x4xf32>
    %21 = vector.broadcast %12 : vector<2x8x1xf32> to vector<2x8x4xf32>
    %22 = arith.mulf %20, %21 : vector<2x8x4xf32>
    %23 = arith.addf %17, %22 : vector<2x8x4xf32>
    %cst_11 = arith.constant dense<0.000000e+00> : vector<2x4xf32>
    %24 = vector.multi_reduction <add>, %23, %cst_11 [1] : vector<2x8x4xf32> to vector<2x4xf32>
    %25 = vector.shape_cast %24 : vector<2x4xf32> to vector<2x1x4xf32>
    %cst_12 = arith.constant 0.000000e+00 : f32
    %26 = vector.broadcast %cst_12 : f32 to vector<2x1x4xf32>
    %27 = arith.maximumf %25, %26 : vector<2x1x4xf32>
    %c0_13 = arith.constant 0 : index
    %c0_14 = arith.constant 0 : index
    %28 = vector.load %arg6[%c0_13, %c0_14] : memref<8x4xf32, #tpu.memory_space<vmem>>, vector<8x4xf32>
    %29 = vector.shape_cast %28 : vector<8x4xf32> to vector<1x8x4xf32>
    %30 = vector.broadcast %29 : vector<1x8x4xf32> to vector<2x8x4xf32>
    %31 = vector.broadcast %27 : vector<2x1x4xf32> to vector<2x8x4xf32>
    %32 = arith.mulf %30, %31 : vector<2x8x4xf32>
    %cst_15 = arith.constant dense<0.000000e+00> : vector<2x8xf32>
    %33 = vector.multi_reduction <add>, %32, %cst_15 [2] : vector<2x8x4xf32> to vector<2x8xf32>
    %34 = vector.shape_cast %33 : vector<2x8xf32> to vector<2x8x1xf32>
    %cst_16 = arith.constant dense<0xFF800000> : vector<2x1xf32>
    %35 = vector.multi_reduction <maximumf>, %34, %cst_16 [1] : vector<2x8x1xf32> to vector<2x1xf32>
    %36 = vector.shape_cast %35 : vector<2x1xf32> to vector<2x1x1xf32>
    %37 = vector.broadcast %36 : vector<2x1x1xf32> to vector<2x8x1xf32>
    %38 = arith.subf %34, %37 : vector<2x8x1xf32>
    %39 = math.exp %38 : vector<2x8x1xf32>
    %cst_17 = arith.constant dense<0.000000e+00> : vector<2x1xf32>
    %40 = vector.multi_reduction <add>, %39, %cst_17 [1] : vector<2x8x1xf32> to vector<2x1xf32>
    %41 = vector.shape_cast %40 : vector<2x1xf32> to vector<2x1x1xf32>
    %42 = vector.broadcast %41 : vector<2x1x1xf32> to vector<2x8x1xf32>
    %43 = arith.divf %39, %42 : vector<2x8x1xf32>
    %cst_18 = arith.constant 1.000000e+00 : f32
    %44 = vector.broadcast %cst_18 : f32 to vector<2x8x1xf32>
    %45 = arith.addf %44, %43 : vector<2x8x1xf32>
    %46 = vector.broadcast %45 : vector<2x8x1xf32> to vector<2x8x256xf32>
    %47 = arith.mulf %0, %46 : vector<2x8x256xf32>
    %c0_19 = arith.constant 0 : index
    %c0_20 = arith.constant 0 : index
    %c0_21 = arith.constant 0 : index
    %48 = vector.load %arg7[%c0_19, %c0_20, %c0_21] : memref<2x8x256xf32, #tpu.memory_space<vmem>>, vector<2x8x256xf32>
    tpu.vector_store %arg7[%c0_19, %c0_20, %c0_21], %47 {strides = array<i32>} : memref<2x8x256xf32, #tpu.memory_space<vmem>>, vector<2x8x256xf32>,
    return
  }
  func.func @transform_0(%arg0: i32) -> (i32, i32, i32) {
    %c0_i32 = arith.constant 0 : i32
    %c0_i32_0 = arith.constant 0 : i32
    %c0_i32_1 = arith.constant 0 : i32
    return %arg0, %c0_i32, %c0_i32_0 : i32, i32, i32
  }
  func.func @transform_1(%arg0: i32) -> (i32, i32) {
    %c0_i32 = arith.constant 0 : i32
    %c0_i32_0 = arith.constant 0 : i32
    %c0_i32_1 = arith.constant 0 : i32
    return %c0_i32, %c0_i32_0 : i32, i32
  }
  func.func @transform_2(%arg0: i32) -> (i32, i32) {
    %c0_i32 = arith.constant 0 : i32
    %c0_i32_0 = arith.constant 0 : i32
    %c0_i32_1 = arith.constant 0 : i32
    return %c0_i32, %c0_i32_0 : i32, i32
  }
  func.func @transform_3(%arg0: i32) -> (i32, i32) {
    %c0_i32 = arith.constant 0 : i32
    %c0_i32_0 = arith.constant 0 : i32
    %c0_i32_1 = arith.constant 0 : i32
    return %c0_i32, %c0_i32_0 : i32, i32
  }
  func.func @transform_4(%arg0: i32) -> (i32, i32) {
    %c0_i32 = arith.constant 0 : i32
    %c0_i32_0 = arith.constant 0 : i32
    %c0_i32_1 = arith.constant 0 : i32
    return %c0_i32, %c0_i32_0 : i32, i32
  }
  func.func @transform_5(%arg0: i32) -> (i32, i32) {
    %c0_i32 = arith.constant 0 : i32
    %c0_i32_0 = arith.constant 0 : i32
    %c0_i32_1 = arith.constant 0 : i32
    return %c0_i32, %c0_i32_0 : i32, i32
  }
  func.func @transform_6(%arg0: i32) -> (i32, i32, i32) {
    %c0_i32 = arith.constant 0 : i32
    %c0_i32_0 = arith.constant 0 : i32
    %c0_i32_1 = arith.constant 0 : i32
    return %arg0, %c0_i32, %c0_i32_0 : i32, i32, i32
  }
}

</mosaic_0001>

<bundles_post_ra>
// kernel: adaptive_channel_selection.1
= control target key start
LH: loop header
LB: loop body
LE: loop exit
PB: predicated region body
PF: predicated region fallthrough
CT: control target
= control target key end

     0   :  { %v29_v0 = vlaneseq  ;;  %vm79_vm0 = vcmask 31744   ;;  %s259_s2 = inlined_call_operand.vmem [shape: f32[1,256], index: 2, kind: input, shape index: {}]   ;;  %s260_s1 = inlined_call_operand.vmem [shape: f32[1,256], index: 1, kind: input, shape index: {}]   ;;  %s261_s0 = inlined_call_operand.vmem [shape: f32[2,8,256], index: 0, kind: input, shape index: {}]   ;;  %s262_s4 = inlined_call_operand.vmem [shape: f32[8,4], index: 4, kind: input, shape index: {}]   ;;  %s263_s3 = inlined_call_operand.vmem [shape: f32[8,4], index: 3, kind: input, shape index: {}]   ;;  %s264_s5 = inlined_call_operand.vmem [shape: f32[8,4], index: 5, kind: input, shape index: {}]   ;;  %s265_s6 = inlined_call_operand.vmem [shape: f32[2,8,256], index: 6, kind: output, shape index: {}]  }
   0x1   :  { %v49_v2 = vld [vmem:[%s259_s2] sm:$0x3]  ;;  %v210_v7 = vld [vmem:[%s261_s0 + $0x8] sm:$0xff]  ;;  %v215_v12 = vld [vmem:[%s261_s0 + $0x10] sm:$0xff] }
   0x2   :  { %v30_v1 = vshrl.u32 %v29_v0, 7  ;;  %v27_v3 = vld [vmem:[%s260_s1] sm:$0x3]  ;;  %v220_v13 = vld [vmem:[%s261_s0 + $0x18] sm:$0xff] }
   0x3   :  { %v205_v6 = vld [vmem:[%s261_s0] sm:$0xff] }
   0x4   :  { %v31_v4 = vsub.s32 0, %v30_v1  ;;  %v35_v5 = vsub.s32 1, %v30_v1  ;;  %v74_v26 = vld [vmem:[%s262_s4] sm:$0xff] }
   0x5   :  { %v71_v27 = vld [vmem:[%s263_s3] sm:$0xff] }
   0x6   :  { %v54_v8 = vrot.slane %v49_v2, %v31_v4  ;;  %v58_v9 = vrot.slane %v49_v2, %v35_v5  ;;  %v32_v10 = vrot.slane %v27_v3, %v31_v4  ;;  %v36_v11 = vrot.slane %v27_v3, %v35_v5  ;;  %v96_v50 = vld [vmem:[%s264_s5] sm:$0xff] }
   0x8   :  { %v61_v14 = vmul.f32 %v54_v8, %v205_v6  ;;  %v62_v15 = vmul.f32 %v58_v9, %v210_v7  ;;  %v39_v16 = vmul.f32 %v32_v10, %v205_v6  ;;  %v40_v17 = vmul.f32 %v36_v11, %v210_v7 }
   0x9   :  { %v63_v18 = vmul.f32 %v54_v8, %v215_v12  ;;  %v64_v19 = vmul.f32 %v58_v9, %v220_v13  ;;  %v41_v20 = vmul.f32 %v32_v10, %v215_v12  ;;  %v42_v21 = vmul.f32 %v36_v11, %v220_v13 }
   0xa   :  { %v65_v22 = vadd.f32 %v62_v15, %v61_v14  ;;  %v43_v23 = vadd.f32 %v40_v17, %v39_v16 }
   0xb   :  { %v68_v24 = vadd.f32 %v64_v19, %v63_v18  ;;  %v46_v25 = vadd.f32 %v42_v21, %v41_v20 }
   0xc   :  { %66 = vadd.xlane.f32.xlu1 %v65_v22  ;;  %44 = vadd.xlane.f32.xlu0 %v43_v23 }
  0x10   :  { %69 = vadd.xlane.f32.xlu1 %v68_v24  ;;  %47 = vadd.xlane.f32.xlu0 %v46_v25 }
  0x95   :  { %v67_v28 = vpop.xlane.xlu1 %66  ;;  %v45_v29 = vpop.xlane.xlu0 %44 }
  0x96   :  { %v75_v30 = vmul.f32 %v74_v26, %v67_v28  ;;  %v72_v31 = vmul.f32 %v71_v27, %v45_v29 }
  0x98   :  { %v77_v32 = vadd.f32 %v75_v30, %v72_v31 }
  0x99   :  { %v70_v33 = vpop.xlane.xlu1 %69  ;;  %v48_v34 = vpop.xlane.xlu0 %47 }
  0x9a   :  { %v80_v35 = vsel %vm79_vm0, %v77_v32, 0.0  ;;  %v76_v36 = vmul.f32 %v74_v26, %v70_v33  ;;  %v73_v37 = vmul.f32 %v71_v27, %v48_v34 }
  0x9b   :  { %v81_v38 = vrot.slane %v80_v35, 4 }
  0x9c   :  { %v78_v39 = vadd.f32 %v76_v36, %v73_v37 }
  0x9d   :  { %v82_v40 = vadd.f32 %v81_v38, %v80_v35 }
  0x9e   :  { %v87_v41 = vsel %vm79_vm0, %v78_v39, 0.0 }
  0x9f   :  { %v83_v42 = vrot.slane %v82_v40, 2  ;;  %v88_v43 = vrot.slane %v87_v41, 4 }
  0xa1   :  { %v89_v44 = vadd.f32 %v88_v43, %v87_v41  ;;  %v84_v45 = vadd.f32 %v83_v42, %v82_v40 }
  0xa3   :  { %v90_v46 = vrot.slane %v89_v44, 2  ;;  %v85_v47 = vrot.slane %v84_v45, 1 }
  0xa5   :  { %v86_v48 = vadd.f32 %v85_v47, %v84_v45  ;;  %v91_v49 = vadd.f32 %v90_v46, %v89_v44 }
  0xa7   :  { %v94_v51 = vmax.f32 %v86_v48, 0.0  ;;  %v92_v52 = vrot.slane %v91_v49, 1 }
  0xa9   :  { %v97_v53 = vmul.f32 %v96_v50, %v94_v51  ;;  %v93_v54 = vadd.f32 %v92_v52, %v91_v49 }
  0xab   :  { %v99_v55 = vsel %vm79_vm0, %v97_v53, 0.0  ;;  %v95_v56 = vmax.f32 %v93_v54, 0.0 }
  0xac   :  { %100 = vadd.xlane.f32.xlu0 %v99_v55 }
  0xad   :  { %v98_v57 = vmul.f32 %v96_v50, %v95_v56 }
  0xaf   :  { %v102_v58 = vsel %vm79_vm0, %v98_v57, 0.0 }
  0xb0   :  { %103 = vadd.xlane.f32.xlu1 %v102_v58 }
 0x135   :  { %v101_v59 = vpop.xlane.xlu0 %100 }
 0x136   :  { %v105_v60 = vrot.slane %v101_v59, 4 }
 0x138   :  { %v106_v61 = vmax.f32 %v101_v59, %v105_v60 }
 0x139   :  { %v104_v62 = vpop.xlane.xlu1 %103 }
 0x13a   :  { %v107_v63 = vrot.slane %v106_v61, 2  ;;  %v111_v0 = vrot.slane %v104_v62, 4 }
 0x13c   :  { %v108_v1 = vmax.f32 %v106_v61, %v107_v63  ;;  %v112_v2 = vmax.f32 %v104_v62, %v111_v0 }
 0x13e   :  { %v109_v3 = vrot.slane %v108_v1, 1  ;;  %v113_v4 = vrot.slane %v112_v2, 2 }
 0x140   :  { %v110_v5 = vmax.f32 %v108_v1, %v109_v3  ;;  %v114_v8 = vmax.f32 %v112_v2, %v113_v4 }
 0x142   :  { %v117_v9 = vsub.f32 %v101_v59, %v110_v5  ;;  %v115_v10 = vrot.slane %v114_v8, 1 }
 0x144   :  { %v119_v11 = vmul.f32 1.442695, %v117_v9  ;;  %v116_v14 = vmax.f32 %v114_v8, %v115_v10 }
 0x146   :  { %153 = vpow2.f32 %v119_v11  ;;  %v118_v15 = vsub.f32 %v104_v62, %v116_v14 }
 0x148   :  { %v121_v16 = vmul.f32 1.442695, %v118_v15 }
 0x14a   :  { %155 = vpow2.f32 %v121_v16 }
 0x153   :  { %v154_v17 = vpop.eup %153 }
 0x154   :  { %v123_v18 = vrot.slane %v154_v17, 4 }
 0x156   :  { %v124_v19 = vadd.f32 %v154_v17, %v123_v18 }
 0x157   :  { %v156_v20 = vpop.eup %155 }
 0x158   :  { %v125_v21 = vrot.slane %v124_v19, 2  ;;  %v129_v22 = vrot.slane %v156_v20, 4 }
 0x15a   :  { %v126_v23 = vadd.f32 %v125_v21, %v124_v19  ;;  %v130_v24 = vadd.f32 %v156_v20, %v129_v22 }
 0x15c   :  { %v127_v25 = vrot.slane %v126_v23, 1  ;;  %v131_v26 = vrot.slane %v130_v24, 2 }
 0x15e   :  { %v128_v27 = vadd.f32 %v127_v25, %v126_v23  ;;  %v132_v28 = vadd.f32 %v131_v26, %v130_v24 }
 0x160   :  { %157 = vrcp.f32 %v128_v27  ;;  %v133_v29 = vrot.slane %v132_v28, 1 }
 0x162   :  { %v134_v30 = vadd.f32 %v133_v29, %v132_v28 }
 0x164   :  { %159 = vrcp.f32 %v134_v30 }
 0x16d   :  { %v158_v31 = vpop.eup %157 }
 0x16e   :  { %v136_v32 = vmul.f32 %v158_v31, %v154_v17 }
 0x170   :  { %v139_v33 = vadd.f32 1.0, %v136_v32 }
 0x171   :  { %v160_v34 = vpop.eup %159 }
 0x172   :  { %v141_v35 = vmul.f32 %v139_v33, %v205_v6  ;;  %v142_v36 = vmul.f32 %v139_v33, %v210_v7  ;;  %v138_v37 = vmul.f32 %v160_v34, %v156_v20 }
 0x174   :  { %145 = vst [vmem:[%s265_s6] sm:$0xff] %v141_v35  ;;  %146 = vst [vmem:[%s265_s6 + $0x8] sm:$0xff] %v142_v36  ;;  %v140_v38 = vadd.f32 1.0, %v138_v37 }
 0x176   :  { %v143_v39 = vmul.f32 %v140_v38, %v215_v12  ;;  %v144_v40 = vmul.f32 %v140_v38, %v220_v13 }
 0x178   :  { %147 = vst [vmem:[%s265_s6 + $0x10] sm:$0xff] %v143_v39  ;;  %148 = vst [vmem:[%s265_s6 + $0x18] sm:$0xff] %v144_v40 }

</bundles_post_ra>
